<compile_context>
chip_gen: v7x
topology: tpu7x:2x2x1
jax: 0.10.0
libtpu: 0.0.40
codegen_flags: <defaults>
</compile_context>

<pallas_src>
import functools

import jax
import jax.numpy as jnp
from jax.experimental import pallas as pl
from jax.experimental.pallas import tpu as pltpu


def _round_up(x, m):
    return ((x + m - 1) // m) * m


def _ffn_kernel(x_ref, w1_ref, b1_ref, w2_ref, b2_ref, o_ref, acc_ref):
    # x_ref : (tm, Ep)     row tile, native dtype
    # w1_ref: (Ep, th)     W1 column slab
    # b1_ref: (1, th)
    # w2_ref: (th, Ep)     W2 row slab
    # b2_ref: (1, Ep)
    # o_ref : (tm, Ep)
    # acc_ref: (tm, Ep) f32 accumulator (persists across the hidden axis)
    j = pl.program_id(1)

    @pl.when(j == 0)
    def _():
        # Seed the accumulator with the output bias (added exactly once).
        acc_ref[...] = jnp.broadcast_to(
            b2_ref[...].astype(jnp.float32), acc_ref.shape)

    # First matmul on the MXU in the operands' native dtype, f32 accumulation.
    h = jnp.dot(x_ref[...], w1_ref[...], preferred_element_type=jnp.float32)
    h = h + b1_ref[...].astype(jnp.float32)

    # GELU (tanh approximation) in f32 — matches the PyTorch reference formula.
    c = jnp.sqrt(jnp.float32(2.0 / jnp.pi))
    h = 0.5 * h * (1.0 + jnp.tanh(c * (h + 0.044715 * h * h * h)))

    # Second matmul: cast the activation back to the weight dtype for the MXU,
    # accumulate in f32.
    acc_ref[...] += jnp.dot(h.astype(w2_ref.dtype), w2_ref[...],
                            preferred_element_type=jnp.float32)

    @pl.when(j == pl.num_programs(1) - 1)
    def _():
        o_ref[...] = acc_ref[...].astype(o_ref.dtype)


@functools.partial(jax.jit, static_argnames=("tm", "th"))
def feed_forward(x, w1, b1, w2, b2, *, tm=256, th=512):
    """x: (B, T, E) -> (B, T, E). Weights: w1 (E, H), b1 (H,), w2 (H, E), b2 (E,)."""
    B, T, E = x.shape
    H = w1.shape[1]
    M = B * T

    # Tile sizes: rows multiple of 8 (sublane), hidden/E multiples of 128 (lane).
    tm = _round_up(tm, 8)
    th = _round_up(th, 128)

    E_pad = _round_up(E, 128)
    tm_eff = min(tm, _round_up(M, 8))
    M_pad = _round_up(M, tm_eff)
    th_eff = min(th, _round_up(H, 128))
    H_pad = _round_up(H, th_eff)

    # Zero padding keeps the math exact: padded x cols / w1 rows / w1 cols /
    # b1 / w2 rows / w2 cols / b2 are all zero, so padded outputs are zero and
    # padded hidden units contribute GELU(0) * 0 = 0.
    x2d = jnp.pad(x.reshape(M, E), ((0, M_pad - M), (0, E_pad - E)))
    w1p = jnp.pad(w1, ((0, E_pad - E), (0, H_pad - H)))
    b1p = jnp.pad(b1, (0, H_pad - H)).reshape(1, H_pad)
    w2p = jnp.pad(w2, ((0, H_pad - H), (0, E_pad - E)))
    b2p = jnp.pad(b2, (0, E_pad - E)).reshape(1, E_pad)

    grid = (M_pad // tm_eff, H_pad // th_eff)

    # VMEM budget for the chosen tiles (double-buffered inputs/outputs + f32 acc),
    # with headroom; clamped to stay safe on v7x's 64 MiB per-TC VMEM.
    itemsize = jnp.dtype(x.dtype).itemsize
    per_step = (tm_eff * E_pad          # x tile
                + E_pad * th_eff        # w1 slab
                + th_eff                # b1 slab
                + th_eff * E_pad        # w2 slab
                + E_pad                 # b2
                + tm_eff * E_pad        # out tile
                ) * itemsize
    vmem_bytes = 2 * per_step + tm_eff * E_pad * 4
    vmem_limit = min(max(int(vmem_bytes * 1.5), 32 * 1024 * 1024),
                     60 * 1024 * 1024)

    out2d = pl.pallas_call(
        _ffn_kernel,
        out_shape=jax.ShapeDtypeStruct((M_pad, E_pad), x.dtype),
        grid_spec=pltpu.PrefetchScalarGridSpec(
            num_scalar_prefetch=0,
            grid=grid,
            in_specs=[
                pl.BlockSpec((tm_eff, E_pad), lambda i, j: (i, 0)),   # x row tile
                pl.BlockSpec((E_pad, th_eff), lambda i, j: (0, j)),   # W1 column slab
                pl.BlockSpec((1, th_eff),     lambda i, j: (0, j)),   # b1 slab
                pl.BlockSpec((th_eff, E_pad), lambda i, j: (j, 0)),   # W2 row slab
                pl.BlockSpec((1, E_pad),      lambda i, j: (0, 0)),   # b2
            ],
            out_specs=pl.BlockSpec((tm_eff, E_pad), lambda i, j: (i, 0)),
            scratch_shapes=[pltpu.VMEM((tm_eff, E_pad), jnp.float32)],
        ),
        compiler_params=pltpu.CompilerParams(
            dimension_semantics=("parallel", "arbitrary"),
            vmem_limit_bytes=vmem_limit),
    )(x2d, w1p, b1p, w2p, b2p)

    return out2d[:M, :E].reshape(B, T, E)


def _reference(x, w1, b1, w2, b2):
    h = x @ w1 + b1
    c = jnp.sqrt(2.0 / jnp.pi)
    h = 0.5 * h * (1.0 + jnp.tanh(c * (h + 0.044715 * h ** 3)))
    return h @ w2 + b2


if __name__ == "__main__":
    emb_dim = 32
    hidden = 4 * emb_dim  # 128
    batch, seq = 2, 8

    key = jax.random.PRNGKey(0)
    kx, kw1, kb1, kw2, kb2 = jax.random.split(key, 5)

    x = jax.random.normal(kx, (batch, seq, emb_dim), dtype=jnp.float32)

    # Deterministic parameter init (PyTorch-Linear-like uniform fan_in bound).
    bound1 = 1.0 / jnp.sqrt(emb_dim)
    w1 = jax.random.uniform(kw1, (emb_dim, hidden), jnp.float32, -bound1, bound1)
    b1 = jax.random.uniform(kb1, (hidden,), jnp.float32, -bound1, bound1)
    bound2 = 1.0 / jnp.sqrt(hidden)
    w2 = jax.random.uniform(kw2, (hidden, emb_dim), jnp.float32, -bound2, bound2)
    b2 = jax.random.uniform(kb2, (emb_dim,), jnp.float32, -bound2, bound2)

    out = feed_forward(x, w1, b1, w2, b2)
    out = jax.block_until_ready(out)

    ref = _reference(x, w1, b1, w2, b2)
    assert out.shape == (batch, seq, emb_dim)
    assert jnp.allclose(out, ref, atol=1e-5, rtol=1e-5), "mismatch vs reference"

    print("KERNEL_OK")
</pallas_src>

<mosaic_0001>
module attributes {stable_mosaic.version = 11 : i64} {
  func.func @_ffn_kernel(%arg0: i32, %arg1: i32, %arg2: memref<16x128xf32, #tpu.memory_space<vmem>>, %arg3: memref<128x128xf32, #tpu.memory_space<vmem>>, %arg4: memref<1x128xf32, #tpu.memory_space<vmem>>, %arg5: memref<128x128xf32, #tpu.memory_space<vmem>>, %arg6: memref<1x128xf32, #tpu.memory_space<vmem>>, %arg7: memref<16x128xf32, #tpu.memory_space<vmem>>, %arg8: memref<16x128xf32, #tpu.memory_space<vmem>>) attributes {dimension_semantics = [#tpu.dimension_semantics<parallel>, #tpu.dimension_semantics<arbitrary>], iteration_bounds = array<i64: 1, 1>, scalar_prefetch = 0 : i64, scratch_operands = 1 : i64, tpu.core_type = #tpu.core_type<tc>, window_params = [{transform_indices = @transform_0, window_bounds = array<i64: 16, 128>}, {transform_indices = @transform_1, window_bounds = array<i64: 128, 128>}, {transform_indices = @transform_2, window_bounds = array<i64: 1, 128>}, {transform_indices = @transform_3, window_bounds = array<i64: 128, 128>}, {pipeline_mode = #tpu.pipeline_mode<synchronous>, transform_indices = @transform_4, window_bounds = array<i64: 1, 128>}, {transform_indices = @transform_5, window_bounds = array<i64: 16, 128>}]} {
    %c0_i32 = arith.constant 0 : i32
    %0 = arith.cmpi eq, %arg1, %c0_i32 : i32
    %1 = arith.extui %0 : i1 to i32
    %c0_i32_0 = arith.constant 0 : i32
    %2 = arith.cmpi ne, %1, %c0_i32_0 : i32
    scf.if %2 {
      %c0_19 = arith.constant 0 : index
      %c0_20 = arith.constant 0 : index
      %31 = vector.load %arg6[%c0_19, %c0_20] : memref<1x128xf32, #tpu.memory_space<vmem>>, vector<1x128xf32>
      %32 = vector.shape_cast %31 : vector<1x128xf32> to vector<1x128xf32>
      %33 = vector.broadcast %32 : vector<1x128xf32> to vector<16x128xf32>
      %c0_21 = arith.constant 0 : index
      %c0_22 = arith.constant 0 : index
      %34 = vector.load %arg8[%c0_21, %c0_22] : memref<16x128xf32, #tpu.memory_space<vmem>>, vector<16x128xf32>
      tpu.vector_store %arg8[%c0_21, %c0_22], %33 {strides = array<i32>} : memref<16x128xf32, #tpu.memory_space<vmem>>, vector<16x128xf32>,
    } else {
    }
    %c0 = arith.constant 0 : index
    %c0_1 = arith.constant 0 : index
    %3 = vector.load %arg2[%c0, %c0_1] : memref<16x128xf32, #tpu.memory_space<vmem>>, vector<16x128xf32>
    %c0_2 = arith.constant 0 : index
    %c0_3 = arith.constant 0 : index
    %4 = vector.load %arg3[%c0_2, %c0_3] : memref<128x128xf32, #tpu.memory_space<vmem>>, vector<128x128xf32>
    %cst = arith.constant dense<0.000000e+00> : vector<16x128xf32>
    %5 = tpu.matmul %3, %4, %cst {dimension_numbers = #tpu.dot_dimension_numbers<[1], [0], [0], [1], [0, 0, 1, 1], [], []>} : vector<16x128xf32>, vector<128x128xf32>, vector<16x128xf32> -> vector<16x128xf32>
    %c0_4 = arith.constant 0 : index
    %c0_5 = arith.constant 0 : index
    %6 = vector.load %arg4[%c0_4, %c0_5] : memref<1x128xf32, #tpu.memory_space<vmem>>, vector<1x128xf32>
    %7 = vector.broadcast %6 : vector<1x128xf32> to vector<16x128xf32>
    %8 = arith.addf %5, %7 : vector<16x128xf32>
    %cst_6 = arith.constant 0.636619746 : f32
    %9 = math.sqrt %cst_6 : f32
    %cst_7 = arith.constant 5.000000e-01 : f32
    %10 = vector.broadcast %cst_7 : f32 to vector<16x128xf32>
    %11 = arith.mulf %10, %8 : vector<16x128xf32>
    %cst_8 = arith.constant 4.471500e-02 : f32
    %12 = vector.broadcast %cst_8 : f32 to vector<16x128xf32>
    %13 = arith.mulf %12, %8 : vector<16x128xf32>
    %14 = arith.mulf %13, %8 : vector<16x128xf32>
    %15 = arith.mulf %14, %8 : vector<16x128xf32>
    %16 = arith.addf %8, %15 : vector<16x128xf32>
    %17 = vector.broadcast %9 : f32 to vector<16x128xf32>
    %18 = arith.mulf %17, %16 : vector<16x128xf32>
    %19 = math.tanh %18 : vector<16x128xf32>
    %cst_9 = arith.constant 1.000000e+00 : f32
    %20 = vector.broadcast %cst_9 : f32 to vector<16x128xf32>
    %21 = arith.addf %20, %19 : vector<16x128xf32>
    %22 = arith.mulf %11, %21 : vector<16x128xf32>
    %c0_10 = arith.constant 0 : index
    %c0_11 = arith.constant 0 : index
    %23 = vector.load %arg8[%c0_10, %c0_11] : memref<16x128xf32, #tpu.memory_space<vmem>>, vector<16x128xf32>
    %c0_12 = arith.constant 0 : index
    %c0_13 = arith.constant 0 : index
    %24 = vector.load %arg5[%c0_12, %c0_13] : memref<128x128xf32, #tpu.memory_space<vmem>>, vector<128x128xf32>
    %cst_14 = arith.constant dense<0.000000e+00> : vector<16x128xf32>
    %25 = tpu.matmul %22, %24, %cst_14 {dimension_numbers = #tpu.dot_dimension_numbers<[1], [0], [0], [1], [0, 0, 1, 1], [], []>} : vector<16x128xf32>, vector<128x128xf32>, vector<16x128xf32> -> vector<16x128xf32>
    %26 = arith.addf %23, %25 : vector<16x128xf32>
    %c0_15 = arith.constant 0 : index
    %c0_16 = arith.constant 0 : index
    %27 = vector.load %arg8[%c0_15, %c0_16] : memref<16x128xf32, #tpu.memory_space<vmem>>, vector<16x128xf32>
    tpu.vector_store %arg8[%c0_15, %c0_16], %26 {strides = array<i32>} : memref<16x128xf32, #tpu.memory_space<vmem>>, vector<16x128xf32>,
    %c0_i32_17 = arith.constant 0 : i32
    %28 = arith.cmpi eq, %arg1, %c0_i32_17 : i32
    %29 = arith.extui %28 : i1 to i32
    %c0_i32_18 = arith.constant 0 : i32
    %30 = arith.cmpi ne, %29, %c0_i32_18 : i32
    scf.if %30 {
      %c0_19 = arith.constant 0 : index
      %c0_20 = arith.constant 0 : index
      %31 = vector.load %arg8[%c0_19, %c0_20] : memref<16x128xf32, #tpu.memory_space<vmem>>, vector<16x128xf32>
      %c0_21 = arith.constant 0 : index
      %c0_22 = arith.constant 0 : index
      %32 = vector.load %arg7[%c0_21, %c0_22] : memref<16x128xf32, #tpu.memory_space<vmem>>, vector<16x128xf32>
      tpu.vector_store %arg7[%c0_21, %c0_22], %31 {strides = array<i32>} : memref<16x128xf32, #tpu.memory_space<vmem>>, vector<16x128xf32>,
    } else {
    }
    return
  }
  func.func @transform_0(%arg0: i32, %arg1: i32) -> (i32, i32) {
    %c0_i32 = arith.constant 0 : i32
    %c0_i32_0 = arith.constant 0 : i32
    return %arg0, %c0_i32 : i32, i32
  }
  func.func @transform_1(%arg0: i32, %arg1: i32) -> (i32, i32) {
    %c0_i32 = arith.constant 0 : i32
    %c0_i32_0 = arith.constant 0 : i32
    return %c0_i32, %arg1 : i32, i32
  }
  func.func @transform_2(%arg0: i32, %arg1: i32) -> (i32, i32) {
    %c0_i32 = arith.constant 0 : i32
    %c0_i32_0 = arith.constant 0 : i32
    return %c0_i32, %arg1 : i32, i32
  }
  func.func @transform_3(%arg0: i32, %arg1: i32) -> (i32, i32) {
    %c0_i32 = arith.constant 0 : i32
    %c0_i32_0 = arith.constant 0 : i32
    return %arg1, %c0_i32 : i32, i32
  }
  func.func @transform_4(%arg0: i32, %arg1: i32) -> (i32, i32) {
    %c0_i32 = arith.constant 0 : i32
    %c0_i32_0 = arith.constant 0 : i32
    %c0_i32_1 = arith.constant 0 : i32
    return %c0_i32, %c0_i32_0 : i32, i32
  }
  func.func @transform_5(%arg0: i32, %arg1: i32) -> (i32, i32) {
    %c0_i32 = arith.constant 0 : i32
    %c0_i32_0 = arith.constant 0 : i32
    return %arg0, %c0_i32 : i32, i32
  }
}

</mosaic_0001>

<bundles_post_ra>
// kernel: feed_forward.1
= control target key start
LH: loop header
LB: loop body
LE: loop exit
PB: predicated region body
PF: predicated region fallthrough
CT: control target
= control target key end

     0   :  { %s579_s1 = inlined_call_operand.vmem [shape: f32[128,128], index: 1, kind: input, shape index: {}]   ;;  %s580_s0 = inlined_call_operand.vmem [shape: f32[16,128], index: 0, kind: input, shape index: {}]   ;;  %s581_s3 = inlined_call_operand.vmem [shape: f32[128,128], index: 3, kind: input, shape index: {}]   ;;  %s582_s2 = inlined_call_operand.vmem [shape: f32[1,128], index: 2, kind: input, shape index: {}]   ;;  %s583_s4 = inlined_call_operand.vmem [shape: f32[1,128], index: 4, kind: input, shape index: {}]   ;;  %s584_s5 = inlined_call_operand.vmem [shape: f32[16,128], index: 5, kind: output, shape index: {}]  }
   0x1   :  { %v35_v0 = vld [vmem:[%s579_s1] sm:$0xff]  ;;  %v36_v1 = vld [vmem:[%s579_s1 + $0x8] sm:$0xff]  ;;  %v37_v2 = vld [vmem:[%s579_s1 + $0x10] sm:$0xff] }
   0x2   :  { %v367_v3 = vpack.c.bf16 %v36_v1, %v35_v0  ;;  %v38_v4 = vld [vmem:[%s579_s1 + $0x18] sm:$0xff]  ;;  %v39_v6 = vld [vmem:[%s579_s1 + $0x20] sm:$0xff]  ;;  %v40_v7 = vld [vmem:[%s579_s1 + $0x28] sm:$0xff] }
   0x3   :  { %v371_v5 = vpack.c.bf16 %v38_v4, %v37_v2  ;;  %v375_v8 = vpack.c.bf16 %v40_v7, %v39_v6  ;;  %v41_v9 = vld [vmem:[%s579_s1 + $0x30] sm:$0xff]  ;;  %v33_v10 = vld [vmem:[%s580_s0] sm:$0xff]  ;;  %v42_v11 = vld [vmem:[%s579_s1 + $0x38] sm:$0xff] }
   0x4   :  { %368 = vmatprep.subr.bf16.mxu0 %v367_v3  ;;  %329 = vmatprep.mubr.f32.mxu0 %v33_v10  ;;  %v153_v12 = vld [vmem:[%s581_s3] sm:$0xff]  ;;  %v154_v13 = vld [vmem:[%s581_s3 + $0x8] sm:$0xff]  ;;  %v379_v15 = vpack.c.bf16 %v42_v11, %v41_v9  ;;  %v45_v19 = vld [vmem:[%s579_s1 + $0x50] sm:$0xff] }
   0x5   :  { %370 = vmatpush3.bf16.msra.mxu0 %v367_v3  ;;  %v399_v14 = vpack.c.bf16 %v154_v13, %v153_v12  ;;  %v43_v16 = vld [vmem:[%s579_s1 + $0x40] sm:$0xff]  ;;  %v44_v17 = vld [vmem:[%s579_s1 + $0x48] sm:$0xff]  ;;  %v46_v20 = vld [vmem:[%s579_s1 + $0x58] sm:$0xff] }
   0x6   :  { %372 = vmatprep.subr.bf16.mxu0 %v371_v5  ;;  %v383_v18 = vpack.c.bf16 %v44_v17, %v43_v16  ;;  %v387_v21 = vpack.c.bf16 %v46_v20, %v45_v19  ;;  %v47_v22 = vld [vmem:[%s579_s1 + $0x60] sm:$0xff]  ;;  %v48_v23 = vld [vmem:[%s579_s1 + $0x68] sm:$0xff]  ;;  %v49_v25 = vld [vmem:[%s579_s1 + $0x70] sm:$0xff] }
   0x7   :  { %400 = vmatprep.subr.bf16.mxu1 %v399_v14  ;;  %v391_v24 = vpack.c.bf16 %v48_v23, %v47_v22  ;;  %v50_v26 = vld [vmem:[%s579_s1 + $0x78] sm:$0xff]  ;;  %v34_v28 = vld [vmem:[%s580_s0 + $0x8] sm:$0xff]  ;;  %v155_v29 = vld [vmem:[%s581_s3 + $0x10] sm:$0xff] }
   0x8   :  { %402 = vmatpush3.bf16.msra.mxu1 %v399_v14  ;;  %v395_v27 = vpack.c.bf16 %v50_v26, %v49_v25  ;;  %v156_v30 = vld [vmem:[%s581_s3 + $0x18] sm:$0xff]  ;;  %v157_v32 = vld [vmem:[%s581_s3 + $0x20] sm:$0xff]  ;;  %v158_v33 = vld [vmem:[%s581_s3 + $0x28] sm:$0xff] }
   0x9   :  { %374 = vmatpush3.bf16.msra.mxu0 %v371_v5  ;;  %v403_v31 = vpack.c.bf16 %v156_v30, %v155_v29  ;;  %v407_v34 = vpack.c.bf16 %v158_v33, %v157_v32  ;;  %v159_v35 = vld [vmem:[%s581_s3 + $0x30] sm:$0xff]  ;;  %v160_v36 = vld [vmem:[%s581_s3 + $0x38] sm:$0xff]  ;;  %v161_v37 = vld [vmem:[%s581_s3 + $0x40] sm:$0xff] }
   0xa   :  { %376 = vmatprep.subr.bf16.mxu0 %v375_v8  ;;  %v411_v38 = vpack.c.bf16 %v160_v36, %v159_v35  ;;  %v162_v39 = vld [vmem:[%s581_s3 + $0x48] sm:$0xff]  ;;  %v163_v41 = vld [vmem:[%s581_s3 + $0x50] sm:$0xff]  ;;  %v164_v42 = vld [vmem:[%s581_s3 + $0x58] sm:$0xff] }
   0xb   :  { %404 = vmatprep.subr.bf16.mxu1 %v403_v31  ;;  %v415_v40 = vpack.c.bf16 %v162_v39, %v161_v37  ;;  %v419_v43 = vpack.c.bf16 %v164_v42, %v163_v41  ;;  %v165_v44 = vld [vmem:[%s581_s3 + $0x60] sm:$0xff]  ;;  %v166_v45 = vld [vmem:[%s581_s3 + $0x68] sm:$0xff]  ;;  %v167_v47 = vld [vmem:[%s581_s3 + $0x70] sm:$0xff] }
   0xc   :  { %406 = vmatpush3.bf16.msra.mxu1 %v403_v31  ;;  %v423_v46 = vpack.c.bf16 %v166_v45, %v165_v44  ;;  %v168_v48 = vld [vmem:[%s581_s3 + $0x78] sm:$0xff]  ;;  %v260_v50 = vld [vmem:[%s582_s2] ss:$0 sm:$0xff] }
   0xd   :  { %378 = vmatpush3.bf16.msra.mxu0 %v375_v8  ;;  %408 = vmatprep.subr.bf16.mxu1 %v407_v34  ;;  %v427_v49 = vpack.c.bf16 %v168_v48, %v167_v47  ;;  %v259_v9 = vld [vmem:[%s583_s4] ss:$0 sm:$0xff] }
   0xe   :  { %380 = vmatprep.subr.bf16.mxu0 %v379_v15 }
  0x10   :  { %410 = vmatpush3.bf16.msra.mxu1 %v407_v34 }
  0x11   :  { %382 = vmatpush3.bf16.msra.mxu0 %v379_v15  ;;  %412 = vmatprep.subr.bf16.mxu1 %v411_v38 }
  0x12   :  { %384 = vmatprep.subr.bf16.mxu0 %v383_v18 }
  0x14   :  { %414 = vmatpush3.bf16.msra.mxu1 %v411_v38 }
  0x15   :  { %386 = vmatpush3.bf16.msra.mxu0 %v383_v18  ;;  %416 = vmatprep.subr.bf16.mxu1 %v415_v40 }
  0x16   :  { %388 = vmatprep.subr.bf16.mxu0 %v387_v21 }
  0x18   :  { %418 = vmatpush3.bf16.msra.mxu1 %v415_v40 }
  0x19   :  { %390 = vmatpush3.bf16.msra.mxu0 %v387_v21  ;;  %420 = vmatprep.subr.bf16.mxu1 %v419_v43 }
  0x1a   :  { %392 = vmatprep.subr.bf16.mxu0 %v391_v24 }
  0x1c   :  { %422 = vmatpush3.bf16.msra.mxu1 %v419_v43 }
  0x1d   :  { %394 = vmatpush3.bf16.msra.mxu0 %v391_v24  ;;  %424 = vmatprep.subr.bf16.mxu1 %v423_v46 }
  0x1e   :  { %396 = vmatprep.subr.bf16.mxu0 %v395_v27 }
  0x20   :  { %426 = vmatpush3.bf16.msra.mxu1 %v423_v46 }
  0x21   :  { %398 = vmatpush3.bf16.msra.mxu0 %v395_v27  ;;  %428 = vmatprep.subr.bf16.mxu1 %v427_v49 }
  0x24   :  { %330 = vmatmul.mubr.f32.vlgmr.msra.gmra.mrb[0].mxu0 %v34_v28  ;;  %430 = vmatpush3.bf16.msra.mxu1 %v427_v49 }
  0xf7   :  { %v331_v51 = vpop.f32.mrb[0].mxu0 }
  0xf8   :  { %v130_v52 = vadd.f32 %v331_v51, %v260_v50  ;;  %v124_v53 = vpop.f32.mrb[1].mxu0 }
  0xf9   :  { %v125_v54 = vadd.f32 %v260_v50, %v124_v53 }
  0xfa   :  { %v136_v55 = vmul.f32 0.044715, %v130_v52  ;;  %v134_v6 = vmul.f32 0.5, %v130_v52 }
  0xfb   :  { %v135_v56 = vmul.f32 0.044715, %v125_v54  ;;  %v133_v4 = vmul.f32 0.5, %v125_v54 }
  0xfc   :  { %v138_v57 = vmul.f32 %v136_v55, %v130_v52 }
  0xfd   :  { %v137_v58 = vmul.f32 %v135_v56, %v125_v54 }
  0xfe   :  { %v140_v59 = vmul.f32 %v138_v57, %v130_v52 }
  0xff   :  { %v139_v60 = vmul.f32 %v137_v58, %v125_v54 }
 0x100   :  { %v142_v61 = vadd.f32 %v140_v59, %v130_v52 }
 0x101   :  { %v141_v62 = vadd.f32 %v139_v60, %v125_v54 }
 0x102   :  { %v144_v63 = vmul.f32 0.7978845, %v142_v61 }
 0x103   :  { %v143_v0 = vmul.f32 0.7978845, %v141_v62 }
 0x104   :  { %431 = vtanh.f32 %v144_v63 }
 0x105   :  { %433 = vtanh.f32 %v143_v0 }
 0x10e   :  { %v432_v1 = vpop.eup %431 }
 0x10f   :  { %v434_v2 = vpop.eup %433  ;;  %v148_v3 = vadd.f32 1.0, %v432_v1 }
 0x110   :  { %v147_v5 = vadd.f32 1.0, %v434_v2 }
 0x111   :  { %v150_v8 = vmul.f32 %v148_v3, %v134_v6 }
 0x112   :  { %v149_v7 = vmul.f32 %v147_v5, %v133_v4 }
 0x114   :  { %364 = vmatprep.mubr.f32.mxu1 %v149_v7 }
 0x115   :  { %365 = vmatmul.mubr.f32.vlgmr.msra.gmra.mrb[0].mxu1 %v150_v8 }
 0x1e8   :  { %v366_v10 = vpop.f32.mrb[0].mxu1 }
 0x1e9   :  { %v245_v11 = vadd.f32 %v366_v10, %v259_v9  ;;  %v235_v12 = vpop.f32.mrb[1].mxu1 }
 0x1ea   :  { %v244_v13 = vadd.f32 %v259_v9, %v235_v12 }
 0x1eb   :  { %254 = vst [vmem:[%s584_s5 + $0x8] sm:$0xff] %v245_v11 }
 0x1ec   :  { %253 = vst [vmem:[%s584_s5] sm:$0xff] %v244_v13 }

</bundles_post_ra>
